<compile_context>
chip_gen: v7x
topology: tpu7x:2x2x1
jax: 0.10.0
libtpu: 0.0.40
codegen_flags: <defaults>
</compile_context>

<pallas_src>
import jax
import jax.numpy as jnp
from jax.experimental import pallas as pl
from jax.experimental.pallas import tpu as pltpu


# --------------------------------- kernel -------------------------------------
def _frect_fused_kernel(x_ref, m_ref, b_ref, o_ref):
    # x_ref: (TB, LW)  batch rows on sublanes, flattened (channel, pos) on lanes
    # m_ref: (LW, LW)  composed conv1/2/3 + concat + pad + proj operator
    # b_ref: (1,  LW)  composed bias (sublane-broadcast add)
    # o_ref: (TB, LW)  lane-dense output block (unmasked vst for LW >= 128)
    acc = jnp.dot(x_ref[...], m_ref[...], preferred_element_type=jnp.float32)
    o_ref[...] = jax.nn.sigmoid(acc + b_ref[...]).astype(o_ref.dtype)


# --------------------------- parameter composition -----------------------------
def _compose_operator(params, L, W):
    """Fold conv1/2/3 + concat + zero-pad + dilated/strided proj taps into one
    (L*W, L*W) matrix and a (1, L*W) bias.  Pure parameter preprocessing
    (batch independent, done once); HIGHEST precision so the fused kernel
    matches the staged f32 reference to ~1e-6."""
    w1, b1, w2, b2, w3, b3, wp, bp = params
    hi = jax.lax.Precision.HIGHEST
    ws, bs, Ks = (w1, w2, w3), (b1, b2, b3), (1, 3, 5)
    # A[r][j, o, d, k] = sum_c wp[o, c, j] * w_r[c, d, k]
    A = [jnp.einsum("ocj,cdk->jodk", wp, w, precision=hi) for w in ws]
    # beta[r][j, o] = sum_c wp[o, c, j] * b_r[c]
    beta = [jnp.einsum("ocj,c->jo", wp, b, precision=hi) for b in bs]

    m4 = jnp.zeros((L, W, L, W), jnp.float32)                   # (o, t, d, u)
    bias = jnp.tile(bp[:, None], (1, W)).astype(jnp.float32)    # (o, t)
    # proj taps: out[:, :, t] reads padded-concat columns p = 3t and p = 3t+2
    # (stride 3, dilation 2, pad 3).  Column p maps to concat column s = p - 3,
    # which lives in conv region r at local offset sl; region widths are
    # W (conv1), W-2 (conv2), W-4 (conv3).
    for t in range(W):
        for j in range(2):
            p = 3 * t + 2 * j
            if p < 3 or p >= 3 * W - 3:
                continue                              # zero padding: no term
            s = p - 3
            if s < W:
                r, sl = 0, s                          # from conv1 output
            elif s < 2 * W - 2:
                r, sl = 1, s - W                      # from conv2 output
            else:
                r, sl = 2, s - (2 * W - 2)            # from conv3 output
            m4 = m4.at[:, t, :, sl:sl + Ks[r]].add(A[r][j])
            bias = bias.at[:, t].add(beta[r][j])
    mmat = jnp.transpose(m4, (2, 3, 0, 1)).reshape(L * W, L * W)  # row d*W+u, col o*W+t
    return mmat, bias.reshape(1, L * W)


# --------------------------------- wrapper -------------------------------------
def _choose_tb(B):
    """Batch rows per grid step: multiple of 8 (sublane tile), <=256 rows, and
    keep >=2 grid steps when the batch allows it so the 'parallel' axis shards
    across v7x's two TensorCores.  On 1-TC chips (v5e/v6e) the extra step only
    costs ~0.35 us, so no per-generation switch is needed at these sizes."""
    b8 = -(-B // 8) * 8
    if b8 <= 8:
        return b8, b8
    tb = min(256, max(8, (b8 // 2) // 8 * 8))
    bpad = -(-b8 // tb) * tb
    return tb, bpad


def frect_convolution(x, params):
    """x: (B, L, H, D) float32 -> (B, L, 1, W) with W = H*D."""
    B, L, H, D = x.shape
    W = H * D
    assert W >= 5, "spatial length must be >= 5 for the kernel_size=5 conv"
    LW = L * W
    # Composed operator must fit a single VMEM block (fine at FreCT sizes).
    assert LW * LW * 4 <= (8 << 20), "use the staged kernel / tile Mmat for huge L*H*D"

    mmat, bias = _compose_operator(params, L, W)

    # (B, L, H, D) -> (B, L*W): pure reshape, no transpose, no extra HBM pass.
    x_flat = x.reshape(B, LW)
    tb, bpad = _choose_tb(B)
    if bpad != B:
        x_flat = jnp.pad(x_flat, ((0, bpad - B), (0, 0)))   # junk rows discarded later

    out_flat = pl.pallas_call(
        _frect_fused_kernel,
        out_shape=jax.ShapeDtypeStruct((bpad, LW), x.dtype),
        grid_spec=pltpu.PrefetchScalarGridSpec(
            num_scalar_prefetch=0,
            grid=(bpad // tb,),
            in_specs=[
                pl.BlockSpec((tb, LW), lambda i: (i, 0)),   # x batch rows
                pl.BlockSpec((LW, LW), lambda i: (0, 0)),   # composed weights (64 KiB)
                pl.BlockSpec((1, LW), lambda i: (0, 0)),    # composed bias
            ],
            out_specs=pl.BlockSpec((tb, LW), lambda i: (i, 0)),
        ),
        compiler_params=pltpu.CompilerParams(
            dimension_semantics=("parallel",)),
    )(x_flat, mmat, bias)

    return out_flat[:B].reshape(B, L, 1, W)                 # == .unsqueeze(dim=2)


# ---------------------------- reference (pure JAX) ------------------------------
def _conv1d_ref(x, w, b, stride=1, padding=0, dilation=1):
    out = jax.lax.conv_general_dilated(
        x, w, window_strides=(stride,), padding=[(padding, padding)],
        rhs_dilation=(dilation,), dimension_numbers=("NCH", "OIH", "NCH"))
    return out + b[None, :, None]


def frect_convolution_ref(x, params):
    B, L, H, D = x.shape
    x2d = x.reshape(B, L, H * D)
    w1, b1, w2, b2, w3, b3, wp, bp = params
    y1 = _conv1d_ref(x2d, w1, b1)
    y2 = _conv1d_ref(x2d, w2, b2)
    y3 = _conv1d_ref(x2d, w3, b3)
    y = jnp.concatenate([y1, y2, y3], axis=-1)
    out = jax.nn.sigmoid(_conv1d_ref(y, wp, bp, stride=3, padding=3, dilation=2))
    return out[:, :, None, :]


# ---------------------------------- params --------------------------------------
def init_params(key, win):
    """Deterministic synthetic params matching nn.Conv1d default shapes."""
    ks = jax.random.split(key, 8)
    def uconv(k, o, c, ksz):
        bound = 1.0 / (c * ksz) ** 0.5
        return jax.random.uniform(k, (o, c, ksz), jnp.float32, -bound, bound)
    def ubias(k, c, ksz):
        bound = 1.0 / (c * ksz) ** 0.5
        return jax.random.uniform(k, (win,), jnp.float32, -bound, bound)
    w1, b1 = uconv(ks[0], win, win, 1), ubias(ks[1], win, 1)
    w2, b2 = uconv(ks[2], win, win, 3), ubias(ks[3], win, 3)
    w3, b3 = uconv(ks[4], win, win, 5), ubias(ks[5], win, 5)
    wp, bp = uconv(ks[6], win, win, 2), ubias(ks[7], win, 2)
    return (w1, b1, w2, b2, w3, b3, wp, bp)


if __name__ == "__main__":
    def _run_case(key, B, win, H, D):
        kx, kp = jax.random.split(key)
        x = jax.random.normal(kx, (B, win, H, D), jnp.float32)
        params = init_params(kp, win)
        out = jax.block_until_ready(frect_convolution(x, params))
        ref = jax.block_until_ready(frect_convolution_ref(x, params))
        assert out.shape == ref.shape == (B, win, 1, H * D), (out.shape, ref.shape)
        # 2e-5: f32 MXU accumulation + weight-composition rounding vs staged ref.
        assert bool(jnp.allclose(out, ref, atol=2e-5, rtol=2e-5)), \
            f"mismatch vs reference for shape {(B, win, H, D)}"

    key = jax.random.PRNGKey(0)
    k1, k2 = jax.random.split(key)
    # Main case: LW = 128 lanes, TB = 8, grid of 2 ("parallel" -> both v7x TCs).
    _run_case(k1, 16, 8, 1, 16)
    # Robustness case (review ask): different W/L, H > 1, batch padding, grid of 1.
    _run_case(k2, 4, 16, 2, 4)
    print("KERNEL_OK")
</pallas_src>

<mosaic_0001>
module attributes {stable_mosaic.version = 11 : i64} {
  func.func @_frect_fused_kernel(%arg0: i32, %arg1: memref<8x128xf32, #tpu.memory_space<vmem>>, %arg2: memref<128x128xf32, #tpu.memory_space<vmem>>, %arg3: memref<1x128xf32, #tpu.memory_space<vmem>>, %arg4: memref<8x128xf32, #tpu.memory_space<vmem>>) attributes {dimension_semantics = [#tpu.dimension_semantics<parallel>], iteration_bounds = array<i64: 2>, scalar_prefetch = 0 : i64, scratch_operands = 0 : i64, tpu.core_type = #tpu.core_type<tc>, window_params = [{transform_indices = @transform_0, window_bounds = array<i64: 8, 128>}, {pipeline_mode = #tpu.pipeline_mode<synchronous>, transform_indices = @transform_1, window_bounds = array<i64: 128, 128>}, {pipeline_mode = #tpu.pipeline_mode<synchronous>, transform_indices = @transform_2, window_bounds = array<i64: 1, 128>}, {transform_indices = @transform_3, window_bounds = array<i64: 8, 128>}]} {
    %c0 = arith.constant 0 : index
    %c0_0 = arith.constant 0 : index
    %0 = vector.load %arg1[%c0, %c0_0] : memref<8x128xf32, #tpu.memory_space<vmem>>, vector<8x128xf32>
    %c0_1 = arith.constant 0 : index
    %c0_2 = arith.constant 0 : index
    %1 = vector.load %arg2[%c0_1, %c0_2] : memref<128x128xf32, #tpu.memory_space<vmem>>, vector<128x128xf32>
    %cst = arith.constant dense<0.000000e+00> : vector<8x128xf32>
    %2 = tpu.matmul %0, %1, %cst {dimension_numbers = #tpu.dot_dimension_numbers<[1], [0], [0], [1], [0, 0, 1, 1], [], []>} : vector<8x128xf32>, vector<128x128xf32>, vector<8x128xf32> -> vector<8x128xf32>
    %c0_3 = arith.constant 0 : index
    %c0_4 = arith.constant 0 : index
    %3 = vector.load %arg3[%c0_3, %c0_4] : memref<1x128xf32, #tpu.memory_space<vmem>>, vector<1x128xf32>
    %4 = vector.broadcast %3 : vector<1x128xf32> to vector<8x128xf32>
    %5 = arith.addf %2, %4 : vector<8x128xf32>
    %6 = arith.negf %5 : vector<8x128xf32>
    %7 = math.exp %6 : vector<8x128xf32>
    %cst_5 = arith.constant 1.000000e+00 : f32
    %8 = vector.broadcast %cst_5 : f32 to vector<8x128xf32>
    %9 = arith.addf %8, %7 : vector<8x128xf32>
    %10 = arith.divf %8, %9 : vector<8x128xf32>
    %c0_6 = arith.constant 0 : index
    %c0_7 = arith.constant 0 : index
    %11 = vector.load %arg4[%c0_6, %c0_7] : memref<8x128xf32, #tpu.memory_space<vmem>>, vector<8x128xf32>
    tpu.vector_store %arg4[%c0_6, %c0_7], %10 {strides = array<i32>} : memref<8x128xf32, #tpu.memory_space<vmem>>, vector<8x128xf32>,
    return
  }
  func.func @transform_0(%arg0: i32) -> (i32, i32) {
    %c0_i32 = arith.constant 0 : i32
    %c0_i32_0 = arith.constant 0 : i32
    return %arg0, %c0_i32 : i32, i32
  }
  func.func @transform_1(%arg0: i32) -> (i32, i32) {
    %c0_i32 = arith.constant 0 : i32
    %c0_i32_0 = arith.constant 0 : i32
    %c0_i32_1 = arith.constant 0 : i32
    return %c0_i32, %c0_i32_0 : i32, i32
  }
  func.func @transform_2(%arg0: i32) -> (i32, i32) {
    %c0_i32 = arith.constant 0 : i32
    %c0_i32_0 = arith.constant 0 : i32
    %c0_i32_1 = arith.constant 0 : i32
    return %c0_i32, %c0_i32_0 : i32, i32
  }
  func.func @transform_3(%arg0: i32) -> (i32, i32) {
    %c0_i32 = arith.constant 0 : i32
    %c0_i32_0 = arith.constant 0 : i32
    return %arg0, %c0_i32 : i32, i32
  }
}

</mosaic_0001>

<bundles_post_ra>
// kernel: tpu_custom_call.1
= control target key start
LH: loop header
LB: loop body
LE: loop exit
PB: predicated region body
PF: predicated region fallthrough
CT: control target
= control target key end

     0   :  { %8 = vsyncpa [#allocation3], 0  ;;  %s918_s0 = inlined_call_operand.hbm [shape: f32[16,128], index: 0, kind: input, shape index: {}]   ;;  %s919_s1 = inlined_call_operand.hbm [shape: f32[128,128], index: 1, kind: input, shape index: {}]   ;;  %s920_s2 = inlined_call_operand.vmem [shape: f32[1,128], index: 2, kind: input, shape index: {}]   ;;  %s921_s3 = inlined_call_operand.hbm [shape: f32[16,128], index: 3, kind: output, shape index: {}]  }
   0x1   :  { %10 = vsyncpa [#allocation3 + $0x1], 0 }
   0x2   :  { %11 = vsyncpa [#allocation6], 0 }
   0x3   :  { %12 = vsyncpa [#allocation4], 0 }
   0x4   :  { %14 = vsyncpa [#allocation4 + $0x1], 0  ;;  %s712_s12 = smov 0   ;;  %s714_s13 = smov 0  }
   0x5   :  { %s716_s14 = smov 0   ;;  %s718_s15 = smov 0  }
   0x6 LB: > { %s733_s16 = sadd.s32 4294967295, %s682_s15   ;;  %s396_s17 = sadd.s32 4294967294, %s682_s15   ;;  %s682_s15 = sphi %s718_s15, %s941_s15   ;;  %s678_s14 = sphi %s716_s14, %s940_s14   ;;  %s674_s13 = sphi %s714_s13, %s939_s13   ;;  %s670_s12 = sphi %s712_s12, %s938_s12  }
   0x7   : > { %p40_p0 = scmp.ne.s32.totalorder %s674_s13, %s670_s12  ;;  %p922_p1 = scmp.eq.s32.totalorder %s733_s16, 0 }
   0x8   : > { %p112_p3 = scmp.eq.s32.totalorder %s396_s17, 1  ;;  %p397_p5 = scmp.ge.s32.totalorder %s682_s15, 1 }
   0x9   : > { %p742_p4 = por %p922_p1, %p40_p0  ;;  %p119_p7 = scmp.lt.s32.totalorder %s682_s15, 3 }
   0xa   : > { %p747_p6 = por %p112_p3, %p40_p0  ;;  %s684_s21 = smov [#allocation5]  }
   0xb   : > { %s925_s18 = scalar_select %p742_p4, 1, 0 }
   0xc   : > { %s926_s19 = scalar_select %p747_p6, 1, 0 }
   0xd   : > { %p752_p8 = pnand %p397_p5, %p119_p7  ;;  %s131_s22 = sshll.u32 %s684_s21, 4  ;;  %s756_s22 = int_to_ptr.vmem [resolvable:$true] %s131_s22 }
   0xe   : > { %s768_s24 = sadd.s32 1, %s682_s15   ;;  %s27_s25 = sadd.s32 1, %s678_s14 }
   0xf   : > { %s927_s20 = scalar_select %p752_p8, 1, 0 }
  0x10   : > { %p496_p9 = pneg %p752_p8  ;;  %s24_s26 = ssub.s32 %s682_s15, %s768_s24 }
  0x11   : > { %s554_s29 = scalar_lea.hbm %s919_s1, 2048 }
  0x12   : > { %p763_p11 = pnand %p496_p9, %p922_p1  ;;  %p555_p12 = scmp.ne.s32.totalorder %s919_s1, %s554_s29 }
  0x13   : > { %p561_p5 = scmp.lt.u32.totalorder %s554_s29, %s919_s1 }
  0x14   : > { %p556_p13 = pneg %p763_p11 }
  0x16   : > { %p557_p0 = pnand %p556_p13, %p555_p12 }
  0x18   : > { %p558_p3 = pneg %p557_p0 }
  0x1a   : > { %p563_p7 = pnand %p561_p5, %p558_p3 }
  0x1c   : > { %566 = shalt.err (!%p563_p7)
}
  0x1d   : > { %s567_s7 = scalar_lea.vmem %s756_s22, 2048  ;;  %p575_p2 = scmp.lt.s32.totalorder %s756_s22, %s756_s22 }
  0x1e   : > { %p568_p9 = scmp.ne.s32.totalorder %s756_s22, %s567_s7  ;;  %p576_p6 = scmp.lt.s32.totalorder %s567_s7, %s567_s7 }
  0x20   : > { %p570_p10 = pnand %p568_p9, %p556_p13  ;;  %p577_p4 = por %p576_p6, %p575_p2 }
  0x22   : > { %p571_p1 = pneg %p570_p10 }
  0x24   : > { %p578_p8 = pnand %p577_p4, %p571_p1 }
  0x26   : > { %581 = shalt.err (!%p578_p8)
}
  0x27   : > { %s685_s8 = smov 128   ;;  %s686_s9 = smov 8  }
  0x28   : > { %499 = dma.hbm_to_vmem [thread:$0]  (!%p763_p11), %s919_s1, 2048, %s756_s22, [#allocation6], %s685_s8, %s685_s8, %s686_s9  }
  0x29   : > { %p25_p2 = scmp.eq.s32.totalorder %s24_s26, 0  ;;  %p34_p1 = scmp.ne.s32.totalorder %s678_s14, %s674_s13 }
  0x2a   : > { %p35_p4 = scmp.eq.s32.totalorder %s682_s15, 0  ;;  %p509_p6 = scmp.lt.s32.totalorder %s682_s15, 2 }
  0x2b   : > { %s799_s17 = scalar_select %p25_p2, %s678_s14, %s27_s25  }
  0x2c   : > { %p36_p8 = por %p35_p4, %p34_p1  ;;  %p929_p10 = scmp.eq.s32.totalorder %s733_s16, 1 }
  0x2d   : > { %s148_s27 = sand.u32 1, %s678_s14   ;;  %s401_s28 = sshll.u32 %s682_s15, 7 }
  0x2e   : > { %p803_p12 = por %p929_p10, %p34_p1  ;;  %s400_s29 = sshll.u32 %s148_s27, 3 }
  0x2f   : > { %s812_s4 = scalar_lea.hbm %s918_s0, %s401_s28  ;;  %s152_s22 = scalar_lea.vmem [#allocation2], %s400_s29 }
  0x30   : > { %s159_s25 = sshll.u32 %s152_s22, 4  ;;  %p814_p11 = pnand %p509_p6, %p36_p8  ;;  %s818_s25 = int_to_ptr.vmem [resolvable:$true] %s159_s25 }
  0x31   : > { %s149_s5 = scalar_lea.sflag [#allocation3], %s148_s27  ;;  %s582_s6 = scalar_lea.hbm %s812_s4, 128 }
  0x32   : > { %p583_p13 = scmp.ne.s32.totalorder %s812_s4, %s582_s6  ;;  %p584_p0 = pneg %p814_p11 }
  0x33   : > { %s587_s9 = scalar_lea.hbm %s918_s0, 256  ;;  %p588_p7 = scmp.lt.u32.totalorder %s812_s4, %s918_s0 }
  0x34   : > { %p585_p3 = pnand %p584_p0, %p583_p13  ;;  %p589_p9 = scmp.lt.u32.totalorder %s587_s9, %s582_s6 }
  0x35   : > { %p591_p1 = scmp.lt.u32.totalorder %s582_s6, %s812_s4 }
  0x36   : > { %p586_p5 = pneg %p585_p3  ;;  %p590_p2 = por %p589_p9, %p588_p7 }
  0x38   : > { %p592_p4 = por %p591_p1, %p590_p2 }
  0x3a   : > { %p593_p6 = pnand %p592_p4, %p586_p5 }
  0x3c   : > { %596 = shalt.err (!%p593_p6)
}
  0x3d   : > { %s597_s27 = scalar_lea.vmem %s818_s25, 128  ;;  %s687_s28 = smov [#allocation2]  }
  0x3e   : > { %p598_p8 = scmp.ne.s32.totalorder %s818_s25, %s597_s27  ;;  %s602_s29 = sshll.u32 %s687_s28, 4  ;;  %s603_s29 = int_to_ptr.vmem [resolvable:$false] %s602_s29 }
  0x3f   : > { %s604_s23 = scalar_lea.vmem %s603_s29, 256  ;;  %p605_p3 = scmp.lt.s32.totalorder %s818_s25, %s603_s29 }
  0x40   : > { %p600_p10 = pnand %p598_p8, %p584_p0  ;;  %p606_p7 = scmp.lt.s32.totalorder %s604_s23, %s597_s27 }
  0x42   : > { %p601_p13 = pneg %p600_p10  ;;  %p607_p9 = por %p606_p7, %p605_p3 }
  0x44   : > { %p608_p2 = pnand %p607_p9, %p601_p13 }
  0x46   : > { %611 = shalt.err (!%p608_p2)
}
  0x47   : > { %503 = dma.hbm_to_vmem [thread:$0]  (!%p814_p11), %s812_s4, 128, %s818_s25, %s149_s5  }
  0x48   : > { %p932_p5 = scmp.ne.s32.totalorder %s927_s20, 0 }
  0x49   : > { %s848_s30 = sand.u32 (!%p932_p5), 1, %s674_s13   ;;  %p933_p0 = scmp.ne.s32.totalorder (!%p932_p5), %s925_s18, 0 }
  0x4a   : > { %168 = sbr.rel (%p932_p5) target bundleno = 373 (0x175), region = 32  ;;  %s403_s22 = sshll.u32 (!%p932_p5), %s848_s30, 3 }
  0x4b   : > { %s171_s6 = scalar_lea.sflag (!%p932_p5), [#allocation3], %s848_s30  ;;  %s854_s7 = scalar_lea.vmem (!%p932_p5), [#allocation2], %s403_s22 }
  0x51   : > { %657 = dma.done.wait (%p933_p0), %s171_s6, 128  }
  0x52   : > { %659 = vsyncadd (%p933_p0), %s171_s6, 4294967168  ;;  %p934_p11 = scmp.eq.s32.totalorder %s733_s16, 0 }
  0x54   : > { %661 = dma.done.wait (%p934_p11), [#allocation6], 2048   ;;  %p935_p1 = pmov %p934_p11 }
  0x55   : > { %v688_v0 = vmov 0.0|0.0   ;;  %vm689_vm0 = vmmov 0   ;;  %v690_v1 = vmov 0.0   ;;  %v202_v2 = vld [vmem:[#allocation5] sm:$0xff]  ;;  %v203_v3 = vld [vmem:[#allocation5 + $0x8] sm:$0xff]  ;;  %v204_v4 = vld [vmem:[#allocation5 + $0x10] sm:$0xff] }
  0x56   : > { %663 = vsyncadd (%p935_p1), [#allocation6], 4294965248  ;;  %464 = vmatprep.subr.bf16.mxu0 %v688_v0  ;;  %461 = vmatprep.mubr.msk.f32.mxu0 %vm689_vm0, %v690_v1  ;;  %v465_v5 = vpack.c.bf16 %v203_v3, %v202_v2  ;;  %v205_v6 = vld [vmem:[#allocation5 + $0x18] sm:$0xff]  ;;  %v206_v8 = vld [vmem:[#allocation5 + $0x20] sm:$0xff]  ;;  %s409_s4 = sshll.u32 %s733_s16, 7  ;;  %s200_s25 = scalar_lea.vmem [#allocation7], %s403_s22 }
  0x57   : > { %v468_v7 = vpack.c.bf16 %v205_v6, %v204_v4  ;;  %v207_v9 = vld [vmem:[#allocation5 + $0x28] sm:$0xff]  ;;  %v208_v11 = vld [vmem:[#allocation5 + $0x30] sm:$0xff]  ;;  %v209_v12 = vld [vmem:[#allocation5 + $0x38] sm:$0xff]  ;;  %s316_s26 = sshll.u32 %s200_s25, 4  ;;  %s874_s9 = scalar_lea.hbm %s921_s3, %s409_s4  ;;  %s876_s26 = int_to_ptr.vmem [resolvable:$true] %s316_s26 }
  0x58   : > { %466 = vmatpush3.bf16.msra.mxu0 %v465_v5  ;;  %v471_v10 = vpack.c.bf16 %v207_v9, %v206_v8  ;;  %v474_v13 = vpack.c.bf16 %v209_v12, %v208_v11  ;;  %v210_v14 = vld [vmem:[#allocation5 + $0x40] sm:$0xff]  ;;  %v211_v15 = vld [vmem:[#allocation5 + $0x48] sm:$0xff]  ;;  %v212_v17 = vld [vmem:[#allocation5 + $0x50] sm:$0xff]  ;;  %s303_s10 = scalar_lea.sflag [#allocation4], %s848_s30  ;;  %s612_s11 = scalar_lea.vmem %s876_s26, 128 }
  0x59   : > { %467 = vmatprep.subr.bf16.mxu0 %v688_v0  ;;  %v477_v16 = vpack.c.bf16 %v211_v15, %v210_v14  ;;  %v213_v18 = vld [vmem:[#allocation5 + $0x58] sm:$0xff]  ;;  %v214_v20 = vld [vmem:[#allocation5 + $0x60] sm:$0xff]  ;;  %v215_v21 = vld [vmem:[#allocation5 + $0x68] sm:$0xff]  ;;  %p613_p4 = scmp.ne.s32.totalorder %s876_s26, %s612_s11  ;;  %s691_s16 = smov [#allocation7]  }
  0x5a   : > { %v480_v19 = vpack.c.bf16 %v213_v18, %v212_v17  ;;  %v483_v22 = vpack.c.bf16 %v215_v21, %v214_v20  ;;  %v216_v23 = vld [vmem:[#allocation5 + $0x70] sm:$0xff]  ;;  %v217_v24 = vld [vmem:[#allocation5 + $0x78] sm:$0xff]  ;;  %s616_s27 = sshll.u32 %s691_s16, 4  ;;  %s617_s27 = int_to_ptr.vmem [resolvable:$false] %s616_s27 }
  0x5b   : > { %v486_v25 = vpack.c.bf16 %v217_v24, %v216_v23  ;;  %v201_v26 = vld [vmem:[%s854_s7] sm:$0xff]  ;;  %p614_p6 = pnand %p613_p4, %p803_p12  ;;  %s618_s28 = scalar_lea.vmem %s617_s27, 256 }
  0x5c   : > { %469 = vmatpush3.bf16.msra.mxu0 %v468_v7  ;;  %v406_v27 = vld [vmem:[%s920_s2] ss:$0 sm:$0xff]  ;;  %p619_p10 = scmp.lt.s32.totalorder %s876_s26, %s617_s27  ;;  %p620_p13 = scmp.lt.s32.totalorder %s618_s28, %s612_s11 }
  0x5d   : > { %470 = vmatprep.subr.bf16.mxu0 %v688_v0  ;;  %p615_p8 = pneg %p614_p6 }
  0x5e   : > { %p621_p3 = por %p620_p13, %p619_p10 }
  0x60   : > { %472 = vmatpush3.bf16.msra.mxu0 %v471_v10  ;;  %p622_p7 = pnand %p621_p3, %p615_p8 }
  0x61   : > { %473 = vmatprep.subr.bf16.mxu0 %v688_v0 }
  0x64   : > { %475 = vmatpush3.bf16.msra.mxu0 %v474_v13 }
  0x65   : > { %476 = vmatprep.subr.bf16.mxu0 %v688_v0 }
  0x68   : > { %478 = vmatpush3.bf16.msra.mxu0 %v477_v16 }
  0x69   : > { %479 = vmatprep.subr.bf16.mxu0 %v688_v0 }
  0x6c   : > { %481 = vmatpush3.bf16.msra.mxu0 %v480_v19 }
  0x6d   : > { %482 = vmatprep.subr.bf16.mxu0 %v688_v0 }
  0x70   : > { %484 = vmatpush3.bf16.msra.mxu0 %v483_v22 }
  0x71   : > { %485 = vmatprep.subr.bf16.mxu0 %v688_v0 }
  0x74   : > { %487 = vmatpush3.bf16.msra.mxu0 %v486_v25 }
  0x77   : > { %462 = vmatmul.mubr.f32.vlgmr.msra.gmra.mrb[0].mxu0 %v201_v26 }
 0x14a   : > { %v291_v28 = vpop.f32.mrb[0].mxu0 }
 0x14b   : > { %v292_v29 = vadd.f32 %v406_v27, %v291_v28  ;;  %v463_v30 = vpop.f32.mrb[1].mxu0 }
 0x14d   : > { %v407_v31 = vmul.f32 -1.442695, %v292_v29 }
 0x14f   : > { %550 = vpow2.f32 %v407_v31 }
 0x159   : > { %v551_v32 = vpop.eup %550 }
 0x15a   : > { %v298_v33 = vadd.f32 1.0, %v551_v32 }
 0x15c   : > { %552 = vrcp.f32 %v298_v33 }
 0x166   : > { %v553_v34 = vpop.eup %552 }
 0x167   : > { %301 = vst [vmem:[%s200_s25] sm:$0xff] %v553_v34 }
 0x168   : > { %625 = shalt.err (!%p622_p7)
}
 0x169   : > { %s626_s29 = scalar_lea.hbm %s874_s9, 128  ;;  %s630_s22 = scalar_lea.hbm %s921_s3, 256 }
 0x16a   : > { %p627_p9 = scmp.ne.s32.totalorder %s874_s9, %s626_s29  ;;  %p631_p0 = scmp.lt.u32.totalorder %s874_s9, %s921_s3 }
 0x16b   : > { %p632_p11 = scmp.lt.u32.totalorder %s630_s22, %s626_s29  ;;  %p634_p4 = scmp.lt.u32.totalorder %s626_s29, %s874_s9 }
 0x16c   : > { %p628_p2 = pnand %p627_p9, %p803_p12 }
 0x16d   : > { %p633_p1 = por %p632_p11, %p631_p0 }
 0x16e   : > { %p629_p5 = pneg %p628_p2 }
 0x16f   : > { %p635_p6 = por %p634_p4, %p633_p1 }
 0x171   : > { %p636_p8 = pnand %p635_p6, %p629_p5 }
 0x173   : > { %639 = shalt.err (!%p636_p8)
}
 0x174   : > { %494 = dma.vmem_to_hbm [thread:$0]  (%p803_p12), %s876_s26, 128, %s874_s9, %s303_s10  }
 0x175 PF: > { %s328_s18 = sand.u32 1, %s670_s12   ;;  %p936_p10 = scmp.ne.s32.totalorder %s926_s19, 0 }
 0x176   : > { %p937_p13 = scmp.ge.s32.totalorder %s682_s15, 2  ;;  %s329_s20 = scalar_lea.sflag [#allocation4], %s328_s18 }
 0x178   : > { %p505_p3 = pnand %p937_p13, %p936_p10 }
 0x17a   : > { %665 = dma.done.wait (!%p505_p3), %s329_s20, 128  }
 0x17b   : > { %667 = vsyncadd (!%p505_p3), %s329_s20, 4294967168  ;;  %p17_p7 = scmp.ge.s32.totalorder %s768_s24, 4   ;;  %s938_s12 = smov %s674_s13 }
 0x17c   : > { %s939_s13 = smov %s678_s14  ;;  %s940_s14 = smov %s799_s17 }
 0x17d   : > { %s941_s15 = smov %s768_s24  ;;  %19 = sbr.rel (!%p17_p7) target bundleno = 6 (0x6), region = 81 }
 0x184   :  { %334 = vsyncpa [#allocation3], 1 }
 0x185   :  { %336 = vsyncpa [#allocation3 + $0x1], 1 }
 0x186   :  { %337 = vsyncpa [#allocation6], 1 }
 0x187   :  { %338 = vsyncpa [#allocation4], 1 }
 0x188   :  { %340 = vsyncpa [#allocation4 + $0x1], 1 }

</bundles_post_ra>
